<compile_context>
chip_gen: v5e
topology: v5e:2x2
jax: 0.10.0
libtpu: 0.0.40
codegen_flags: <defaults>
</compile_context>

<pallas_src>
import math
from functools import partial
from typing import NamedTuple

import jax
import jax.numpy as jnp
from jax.experimental import pallas as pl
from jax.experimental.pallas import tpu as pltpu

HIDDEN = 512  # fixed by the module definition (Linear(in_ch, 512))


class Plan(NamedTuple):
    """Static kernel plan (hashable -> usable as a jit static argument)."""
    batch: int
    in_ch: int
    n_features: int
    n_classes: int
    fp: int          # padded feature count actually laid out / streamed
    tf: int          # features processed per grid step
    tb: int          # batch rows processed per grid step
    boxed: bool      # n_classes==1 only: boxed (n_tiles,B,tf) output vs flat (B,fp)
    vmem_limit: int  # scoped VMEM limit handed to Mosaic


def _rup(x, m):
    return -(-x // m) * m


def _vmem_capacity_bytes():
    try:
        return int(pltpu.get_tpu_info().vmem_capacity_bytes)
    except Exception:        # no TPU visible at planning time -> conservative (v7x)
        return 64 * 1024 * 1024


def make_plan(batch, in_ch, n_features, n_classes=1):
    """Choose tiling / VMEM policy once per (shapes, device generation)."""
    mib = 1024 * 1024
    # Generation-aware VMEM policy (128 MiB parts can run much larger tiles;
    # the 64 MiB v7x part gets a tighter cap and we aim for >=2 grid steps).
    vmem_phys = _vmem_capacity_bytes()
    if vmem_phys >= 96 * mib:              # v5e / v6e (128 MiB VMEM)
        tile_budget, vmem_cap = 56 * mib, 96 * mib
    else:                                  # v7x (64 MiB VMEM)
        tile_budget, vmem_cap = 20 * mib, 40 * mib

    # Batch tile: inner grid axis for large batches so f32 hidden activations
    # stay bounded and weight tiles stay resident across batch steps.
    if batch <= 512:
        tb = batch
    else:
        tb = batch
        for cand in (256, 128, 512, 64, 32, 16, 8):
            if batch % cand == 0:
                tb = cand
                break

    # Per-feature VMEM footprint, including (8/16,128) tile padding.
    k_rows = _rup(in_ch + 1, 16)           # bf16 sublane packing of w1 rows
    tb_r = _rup(tb, 8)
    if n_classes == 1:
        w2_pf = 2 * HIDDEN * 2                               # (tf,512) bf16, dbuf
    else:
        w2_pf = 2 * _rup(n_classes, 16) * HIDDEN * 2         # (tf,nc,512) bf16, dbuf
    per_feat = (2 * k_rows * HIDDEN * 2                      # w1 tile, bf16, dbuf
                + w2_pf
                + 3 * tb_r * HIDDEN * 4                      # f32 h + relayout/product temps
                + 2 * tb_r * n_classes * 4)                  # output tile
    fixed = (2 * _rup(tb_r, 16) * _rup(in_ch + 1, 128) * 2   # x tile (lane-padded)
             + 2 * mib)                                      # Mosaic scratch slack

    # Feature padding + tile choice.
    a = 128 // math.gcd(n_classes, 128)    # tf granularity for a lane-dense flat output
    fp_a = _rup(n_features, a)
    if n_classes == 1 and n_features >= a and (fp_a - n_features) * 8 <= n_features:
        fp = fp_a                          # cheap to pad all the way to lane-aligned tiles
    elif n_features > 8:
        fp = _rup(n_features, 8)
    else:
        fp = n_features                    # tiny: a single full-size tile

    cands = [t for t in range(8, fp + 1, 8) if fp % t == 0] or [fp]
    max_tf = max(tile_budget // per_feat, 1)
    feas = [t for t in cands if t <= max_tf] or [min(cands)]
    # TODO(synk): tile the contraction (in_ch) axis when even a single feature
    # column block exceeds the VMEM budget (very large in_ch).
    # TODO(synk): optional int8 (v5e/v6e) / fp8 (v7x) w1 compression would halve
    # HBM traffic on this w1-bandwidth-bound kernel; needs an accuracy review.

    def flat_ok(t):        # per-tile (tb, t) output block is lane-dense / legal
        return n_classes == 1 and (t % 128 == 0 or t == fp)

    def score(t):          # prefer: fits budget -> >=2 grid steps -> lane-dense -> largest
        return ((fp // t) >= 2, flat_ok(t), t)

    tf = max(feas, key=score)

    est = tf * per_feat + fixed + tb_r * fp * n_classes * 4
    vmem_limit = int(min(vmem_cap, max(est * 5 // 4, 32 * mib)))

    return Plan(batch=batch, in_ch=in_ch, n_features=n_features,
                n_classes=n_classes, fp=fp, tf=tf, tb=tb,
                boxed=(n_classes == 1 and not flat_ok(tf)),
                vmem_limit=vmem_limit)


def pack_params(w1, b1, w2, plan):
    """One-time weight packing (keep the results -- do NOT re-pack per call).

    w1: (F, in_ch, 512)   b1: (F, 512)   w2: (F, 512, n_classes)
    Returns:
      w1p: (in_ch+1, fp*512) bf16 -- feature-major columns; the bias is folded
           in as the last row (pairs with the all-ones column appended to x).
      w2p: (fp, 512) bf16 if n_classes==1, else (fp, n_classes, 512) bf16
           (lane-dense: HIDDEN last).
    """
    F, in_ch, H = w1.shape
    assert H == HIDDEN and F == plan.n_features and in_ch == plan.in_ch
    nc, fp = plan.n_classes, plan.fp

    w1aug = jnp.concatenate([jnp.transpose(w1, (1, 0, 2)),        # (in_ch, F, H)
                             b1[None, :, :]], axis=0)             # (in_ch+1, F, H)
    if fp > F:
        w1aug = jnp.concatenate(
            [w1aug, jnp.zeros((in_ch + 1, fp - F, H), w1aug.dtype)], axis=1)
    w1p = w1aug.reshape(in_ch + 1, fp * H).astype(jnp.bfloat16)

    if nc == 1:
        w2p = w2[:, :, 0]                                         # (F, H)
        if fp > F:
            w2p = jnp.concatenate([w2p, jnp.zeros((fp - F, H), w2p.dtype)], 0)
    else:
        w2p = jnp.transpose(w2, (0, 2, 1))                        # (F, nc, H)
        if fp > F:
            w2p = jnp.concatenate(
                [w2p, jnp.zeros((fp - F, nc, H), w2p.dtype)], 0)
    return w1p, w2p.astype(jnp.bfloat16)


def _make_kernel(tf, n_classes, out_mode):
    """out_mode: 'flat' o_ref=(tb,tf) | 'boxed' o_ref=(1,tb,tf) | 'fbc' o_ref=(tf,tb,nc)."""

    def kernel(x_ref, w1_ref, w2_ref, o_ref):
        # First linear (bias folded into the last row of w1 / ones column of x).
        h = jnp.maximum(
            jnp.dot(x_ref[...], w1_ref[...], preferred_element_type=jnp.float32),
            0.0)                                            # (tb, tf*HIDDEN) f32
        tb = h.shape[0]
        h3 = h.reshape(tb, tf, HIDDEN)
        if n_classes == 1:
            # Second linear as VPU multiply + reduction (keeps the MXU free and
            # avoids tf N=1 matmuls); cost hides under the w1 HBM stream.
            # TODO(synk): hidden-major column packing would turn this into pure
            # strided VPU adds; only matters when in_ch is tiny (DMA not binding).
            w2 = w2_ref[...].astype(jnp.float32)            # (tf, HIDDEN)
            pred = jnp.sum(h3 * w2[None, :, :], axis=-1)    # (tb, tf)
            pred = pred.astype(o_ref.dtype)
            if out_mode == "flat":
                o_ref[...] = pred
            else:                                           # boxed
                o_ref[...] = pred[None, :, :]
        else:
            # Feature-batched matmul kept in its natural (f, b, c) order; the
            # tiny output is transposed/flattened outside the kernel.
            pred = jax.lax.dot_general(
                h3.astype(jnp.bfloat16), w2_ref[...],
                dimension_numbers=(((2,), (2,)), ((1,), (0,))),
                preferred_element_type=jnp.float32)         # (tf, tb, nc)
            o_ref[...] = pred.astype(o_ref.dtype)

    return kernel


@partial(jax.jit, static_argnames=("plan",))
def output_block_apply(x, w1p, w2p, plan):
    """Jitted forward on pre-packed weights; matches OutputBlock.forward."""
    if x.ndim < 2:                       # mirrors inputs.unsqueeze(0)
        x = x[None, :]
    B, in_ch = x.shape
    assert (B, in_ch) == (plan.batch, plan.in_ch), (x.shape, plan)
    nc, fp, tf, tb = plan.n_classes, plan.fp, plan.tf, plan.tb
    K = in_ch + 1
    nft, nbt = fp // tf, B // tb
    grid = (nft, nbt)                    # feature tiles outer, batch tiles inner

    # Tiny per-call prep (all heavy packing was done once in pack_params).
    x_aug = jnp.concatenate(
        [x.astype(jnp.bfloat16), jnp.ones((B, 1), jnp.bfloat16)], axis=1)

    x_spec = pl.BlockSpec((tb, K), lambda f, b: (b, 0))
    w1_spec = pl.BlockSpec((K, tf * HIDDEN), lambda f, b: (0, f))   # independent of b
    cparams = pltpu.CompilerParams(
        dimension_semantics=("parallel", "parallel"),
        vmem_limit_bytes=plan.vmem_limit)

    if nc == 1:
        w2_spec = pl.BlockSpec((tf, HIDDEN), lambda f, b: (f, 0))
        if not plan.boxed:
            out = pl.pallas_call(
                _make_kernel(tf, 1, "flat"),
                out_shape=jax.ShapeDtypeStruct((B, fp), jnp.float32),
                grid=grid,
                in_specs=[x_spec, w1_spec, w2_spec],
                out_specs=pl.BlockSpec((tb, tf), lambda f, b: (b, f)),
                compiler_params=cparams,
            )(x_aug, w1p, w2p)
        else:
            out3 = pl.pallas_call(
                _make_kernel(tf, 1, "boxed"),
                out_shape=jax.ShapeDtypeStruct((nft, B, tf), jnp.float32),
                grid=grid,
                in_specs=[x_spec, w1_spec, w2_spec],
                out_specs=pl.BlockSpec((1, tb, tf), lambda f, b: (f, b, 0)),
                compiler_params=cparams,
            )(x_aug, w1p, w2p)
            out = jnp.transpose(out3, (1, 0, 2)).reshape(B, fp)
    else:
        w2_spec = pl.BlockSpec((tf, nc, HIDDEN), lambda f, b: (f, 0, 0))
        outf = pl.pallas_call(
            _make_kernel(tf, nc, "fbc"),
            out_shape=jax.ShapeDtypeStruct((fp, B, nc), jnp.float32),
            grid=grid,
            in_specs=[x_spec, w1_spec, w2_spec],
            out_specs=pl.BlockSpec((tf, tb, nc), lambda f, b: (f, b, 0)),
            compiler_params=cparams,
        )(x_aug, w1p, w2p)
        out = jnp.transpose(outf, (1, 0, 2)).reshape(B, fp * nc)

    return out[:, : plan.n_features * nc]   # drop padded features (torch.cat order)


def output_block_forward(x, w1, b1, w2):
    """One-shot convenience wrapper (re-packs weights every call; for repeated
    use, call make_plan + pack_params once and reuse output_block_apply)."""
    xb = x if x.ndim >= 2 else x[None, :]
    plan = make_plan(xb.shape[0], xb.shape[1], w1.shape[0], w2.shape[-1])
    w1p, w2p = pack_params(w1, b1, w2, plan)
    return output_block_apply(xb, w1p, w2p, plan=plan)


def init_params(key, in_ch, n_features, n_classes=1):
    """Deterministic glorot-style init matching the module's shapes."""
    k1, kb, k2 = jax.random.split(key, 3)
    bound1 = (6.0 / (in_ch + HIDDEN)) ** 0.5
    bound2 = (6.0 / (HIDDEN + n_classes)) ** 0.5
    w1 = jax.random.uniform(k1, (n_features, in_ch, HIDDEN), jnp.float32, -bound1, bound1)
    b1 = jax.random.uniform(kb, (n_features, HIDDEN), jnp.float32, -0.1, 0.1)
    w2 = jax.random.uniform(k2, (n_features, HIDDEN, n_classes), jnp.float32, -bound2, bound2)
    return w1, b1, w2


def _reference(x, w1, b1, w2):
    """Pure-JAX f32 reference of the same forward pass (torch.cat dim=1 order)."""
    if x.ndim < 2:
        x = x[None, :]
    h = jnp.maximum(jnp.einsum("bi,fih->fbh", x, w1) + b1[:, None, :], 0.0)
    pred = jnp.einsum("fbh,fhc->fbc", h, w2)            # (F, B, C)
    return jnp.transpose(pred, (1, 0, 2)).reshape(x.shape[0], -1)


if __name__ == "__main__":
    root = jax.random.PRNGKey(0)

    def run_case(idx, B, in_ch, n_features, n_classes, one_d=False):
        kx, kp = jax.random.split(jax.random.fold_in(root, idx))
        x = jax.random.normal(kx, (B, in_ch), jnp.float32)
        w1, b1, w2 = init_params(kp, in_ch, n_features, n_classes)
        nb = 1 if one_d else B
        plan = make_plan(nb, in_ch, n_features, n_classes)
        w1p, w2p = pack_params(w1, b1, w2, plan)         # one-time packing
        xin = x[0] if one_d else x
        out = jax.block_until_ready(output_block_apply(xin, w1p, w2p, plan=plan))
        ref = _reference(x[0:1] if one_d else x, w1, b1, w2)
        assert out.shape == (nb, n_features * n_classes), (idx, out.shape)
        err = float(jnp.max(jnp.abs(out - ref)))
        # bf16 weight/activation streaming -> relaxed tolerance vs f32 reference.
        assert jnp.allclose(out, ref, atol=3e-2, rtol=3e-2), (idx, err)

    # 1. baseline: single full-size tile (module-default small shape)
    run_case(1, B=8, in_ch=32, n_features=4, n_classes=1)
    # 2. lane-dense multi-step feature tiling (tf=128, 2 "parallel" steps)
    run_case(2, B=8, in_ch=16, n_features=256, n_classes=1)
    # 3. awkward n_features -> boxed-output path (masked narrow stores, no padding blow-up)
    run_case(3, B=8, in_ch=16, n_features=24, n_classes=1)
    # 4. large batch -> inner batch grid axis, weight tiles resident across it
    run_case(4, B=1024, in_ch=16, n_features=8, n_classes=1)
    # 5. general n_classes > 1 path (lane-dense w2, feature-batched matmul)
    run_case(5, B=4, in_ch=16, n_features=3, n_classes=3)
    # 6. 1-D input (unsqueeze) semantics
    run_case(6, B=8, in_ch=32, n_features=4, n_classes=1, one_d=True)

    print("KERNEL_OK")
</pallas_src>

<mosaic_0001>
module attributes {stable_mosaic.version = 11 : i64} {
  func.func @kernel(%arg0: i32, %arg1: i32, %arg2: memref<8x33xbf16, #tpu.memory_space<vmem>>, %arg3: memref<33x2048xbf16, #tpu.memory_space<vmem>>, %arg4: memref<4x512xbf16, #tpu.memory_space<vmem>>, %arg5: memref<8x4xf32, #tpu.memory_space<vmem>>) attributes {dimension_semantics = [#tpu.dimension_semantics<parallel>, #tpu.dimension_semantics<parallel>], iteration_bounds = array<i64: 1, 1>, scalar_prefetch = 0 : i64, scratch_operands = 0 : i64, tpu.core_type = #tpu.core_type<tc>, window_params = [{transform_indices = @transform_0, window_bounds = array<i64: 8, 33>}, {transform_indices = @transform_1, window_bounds = array<i64: 33, 2048>}, {transform_indices = @transform_2, window_bounds = array<i64: 4, 512>}, {transform_indices = @transform_3, window_bounds = array<i64: 8, 4>}]} {
    %c0 = arith.constant 0 : index
    %c0_0 = arith.constant 0 : index
    %0 = vector.load %arg2[%c0, %c0_0] : memref<8x33xbf16, #tpu.memory_space<vmem>>, vector<8x33xbf16>
    %c0_1 = arith.constant 0 : index
    %c0_2 = arith.constant 0 : index
    %1 = vector.load %arg3[%c0_1, %c0_2] : memref<33x2048xbf16, #tpu.memory_space<vmem>>, vector<33x2048xbf16>
    %cst = arith.constant dense<0.000000e+00> : vector<8x2048xf32>
    %2 = tpu.matmul %0, %1, %cst {dimension_numbers = #tpu.dot_dimension_numbers<[1], [0], [0], [1], [0, 0, 1, 1], [], []>} : vector<8x33xbf16>, vector<33x2048xbf16>, vector<8x2048xf32> -> vector<8x2048xf32>
    %cst_3 = arith.constant 0.000000e+00 : f32
    %3 = vector.broadcast %cst_3 : f32 to vector<8x2048xf32>
    %4 = arith.maximumf %2, %3 : vector<8x2048xf32>
    %5 = vector.shape_cast %4 : vector<8x2048xf32> to vector<8x4x512xf32>
    %c0_4 = arith.constant 0 : index
    %c0_5 = arith.constant 0 : index
    %6 = vector.load %arg4[%c0_4, %c0_5] : memref<4x512xbf16, #tpu.memory_space<vmem>>, vector<4x512xbf16>
    %7 = arith.extf %6 : vector<4x512xbf16> to vector<4x512xf32>
    %8 = vector.shape_cast %7 : vector<4x512xf32> to vector<1x4x512xf32>
    %9 = vector.broadcast %8 : vector<1x4x512xf32> to vector<8x4x512xf32>
    %10 = arith.mulf %5, %9 : vector<8x4x512xf32>
    %cst_6 = arith.constant dense<0.000000e+00> : vector<8x4xf32>
    %11 = vector.multi_reduction <add>, %10, %cst_6 [2] : vector<8x4x512xf32> to vector<8x4xf32>
    %c0_7 = arith.constant 0 : index
    %c0_8 = arith.constant 0 : index
    %12 = vector.load %arg5[%c0_7, %c0_8] : memref<8x4xf32, #tpu.memory_space<vmem>>, vector<8x4xf32>
    tpu.vector_store %arg5[%c0_7, %c0_8], %11 {strides = array<i32>} : memref<8x4xf32, #tpu.memory_space<vmem>>, vector<8x4xf32>,
    return
  }
  func.func @transform_0(%arg0: i32, %arg1: i32) -> (i32, i32) {
    %c0_i32 = arith.constant 0 : i32
    %c0_i32_0 = arith.constant 0 : i32
    return %arg1, %c0_i32 : i32, i32
  }
  func.func @transform_1(%arg0: i32, %arg1: i32) -> (i32, i32) {
    %c0_i32 = arith.constant 0 : i32
    %c0_i32_0 = arith.constant 0 : i32
    return %c0_i32, %arg0 : i32, i32
  }
  func.func @transform_2(%arg0: i32, %arg1: i32) -> (i32, i32) {
    %c0_i32 = arith.constant 0 : i32
    %c0_i32_0 = arith.constant 0 : i32
    return %arg0, %c0_i32 : i32, i32
  }
  func.func @transform_3(%arg0: i32, %arg1: i32) -> (i32, i32) {
    %c0_i32 = arith.constant 0 : i32
    return %arg1, %arg0 : i32, i32
  }
}

</mosaic_0001>

<bundles_post_ra>
// kernel: output_block_apply.1
= control target key start
LH: loop header
LB: loop body
LE: loop exit
PB: predicated region body
PF: predicated region fallthrough
CT: control target
= control target key end

     0   :  { %8 = vsyncpa [#allocation3], 0  ;;  %s1279_s15 = smov [#allocation2]   ;;  %s1280_s17 = smov 1024   ;;  %s1588_s0 = inlined_call_operand.vmem [shape: bf16[8,33], index: 0, kind: input, shape index: {}]   ;;  %s1589_s1 = inlined_call_operand.hbm [shape: bf16[33,2048], index: 1, kind: input, shape index: {}]   ;;  %s1590_s2 = inlined_call_operand.vmem [shape: bf16[4,512], index: 2, kind: input, shape index: {}]   ;;  %s1591_s3 = inlined_call_operand.vmem [shape: f32[8,4], index: 3, kind: output, shape index: {}]  }
   0x1   :  { %s15_s14 = sshll.u32 %s1589_s1, 4  ;;  %s17_s16 = sshll.u32 %s1279_s15, 4  ;;  %s16_s14 = int_to_ptr.hbm [resolvable:$true] %s15_s14  ;;  %s18_s16 = int_to_ptr.vmem [resolvable:$true] %s17_s16 }
   0x2   :  { %s1281_s18 = smov 64  }
   0x3   :  { %23 = dma.hbm_to_vmem [thread:$0]  %s16_s14, 5120, %s18_s16, [#allocation3], %s1280_s17, %s1280_s17, %s1281_s18  }
   0x4   :  { %1277 = dma.done.wait [#allocation3], 5120  }
   0x5   :  { %1278 = vsyncadd [#allocation3], 4294962176  ;;  %vm276_vm0 = vcmask 1040384   ;;  %v64_v0 = vld [vmem:[#allocation2 + $0x100] sm:$0x11]  ;;  %v1282_v6 = vmov 0  }
   0x6   :  { %v65_v1 = vld [vmem:[#allocation2 + $0x108] sm:$0x11]  ;;  %v176_v2 = vunpack.c.l.b16 %v64_v0  ;;  %v177_v3 = vunpack.c.h.b16 %v64_v0  ;;  %v1308_v7 = vsel %vm276_vm0, 65535, %v1282_v6  ;;  %v1137_v12 = vld [vmem:[#allocation2 + $0x80] sm:$0xf]  ;;  %vm272_vm1 = vcmask 269312  }
   0x7   :  { %v178_v4 = vunpack.c.l.b16 %v65_v1  ;;  %v179_v5 = vunpack.c.h.b16 %v65_v1  ;;  %v1239_v13 = vld [vmem:[#allocation2 + $0xbc] sm:$0xf0]  ;;  %v1231_v14 = vld [vmem:[#allocation2 + $0x84] sm:$0xf]  ;;  %v1145_v16 = vld [vmem:[#allocation2 + $0x88] sm:$0xf] }
   0x8   :  { %v224_v8 = vpack.c.b16 %v176_v2, %v176_v2  ;;  %v225_v9 = vpack.c.b16 %v177_v3, %v177_v3  ;;  %v1139_v15 = vld [vmem:[#allocation2 + $0xc0] sm:$0xf0]  ;;  %v1240_v21 = vld [vmem:[#allocation2 + $0xc4] sm:$0xf0]  ;;  %v1232_v22 = vld [vmem:[#allocation2 + $0x8c] sm:$0xf]  ;;  %v1138_v26 = vor.u32 %v1239_v13, %v1137_v12 }
   0x9   :  { %v226_v10 = vpack.c.b16 %v178_v4, %v178_v4  ;;  %v227_v11 = vpack.c.b16 %v179_v5, %v179_v5  ;;  %v1147_v23 = vld [vmem:[#allocation2 + $0xc8] sm:$0xf0]  ;;  %v67_v24 = vld [vmem:[#allocation2 + $0x118] sm:$0x11]  ;;  %v66_v25 = vld [vmem:[#allocation2 + $0x110] sm:$0x11]  ;;  %v1142_v27 = vor.u32 %v1231_v14, %v1139_v15  ;;  %v1146_v33 = vor.u32 %v1240_v21, %v1145_v16 }
   0xa   :  { %v280_v17 = vand.u32 %v1308_v7, %v224_v8  ;;  %v283_v18 = vand.u32 %v1308_v7, %v225_v9  ;;  %v1073_v28 = vld [vmem:[#allocation2] sm:$0xf]  ;;  %v1215_v30 = vld [vmem:[#allocation2 + $0x4] sm:$0xf]  ;;  %v183_v31 = vunpack.c.h.b16 %v67_v24  ;;  %v182_v32 = vunpack.c.l.b16 %v67_v24  ;;  %v1081_v36 = vld [vmem:[#allocation2 + $0x8] sm:$0xf] }
   0xb   :  { %v286_v19 = vand.u32 %v1308_v7, %v226_v10  ;;  %v289_v20 = vand.u32 %v1308_v7, %v227_v11  ;;  %v1223_v29 = vld [vmem:[#allocation2 + $0x3c] sm:$0xf0]  ;;  %v1150_v34 = vor.u32 %v1232_v22, %v1147_v23  ;;  %v1075_v35 = vld [vmem:[#allocation2 + $0x40] sm:$0xf0]  ;;  %v1224_v37 = vld [vmem:[#allocation2 + $0x44] sm:$0xf0]  ;;  %v181_v38 = vunpack.c.h.b16 %v66_v25 }
   0xc   :  { %332 = vmatpush.bf16.msra.mxu0 %v280_v17  ;;  %345 = vmatpush.bf16.msra.mxu1 %v283_v18  ;;  %v180_v39 = vunpack.c.l.b16 %v66_v25  ;;  %v1216_v40 = vld [vmem:[#allocation2 + $0xc] sm:$0xf]  ;;  %v231_v42 = vpack.c.b16 %v183_v31, %v183_v31  ;;  %v230_v43 = vpack.c.b16 %v182_v32, %v182_v32  ;;  %v1074_v44 = vor.u32 %v1223_v29, %v1073_v28  ;;  %v1234_v53 = vld [vmem:[#allocation2 + $0x9c] sm:$0xf]  ;;  %v1161_v55 = vld [vmem:[#allocation2 + $0x98] sm:$0xf] }
   0xd   :  { %358 = vmatpush.bf16.msra.mxu2 %v286_v19  ;;  %371 = vmatpush.bf16.msra.mxu3 %v289_v20  ;;  %v1083_v41 = vld [vmem:[#allocation2 + $0x48] sm:$0xf0]  ;;  %v1078_v45 = vor.u32 %v1215_v30, %v1075_v35  ;;  %v1082_v46 = vor.u32 %v1224_v37, %v1081_v36  ;;  %v229_v48 = vpack.c.b16 %v181_v38, %v181_v38  ;;  %v1163_v54 = vld [vmem:[#allocation2 + $0xd8] sm:$0xf0]  ;;  %v1242_v56 = vld [vmem:[#allocation2 + $0xd4] sm:$0xf0] }
   0xe   :  { %v1086_v47 = vor.u32 %v1216_v40, %v1083_v41  ;;  %v228_v49 = vpack.c.b16 %v180_v39, %v180_v39  ;;  %v69_v50 = vld [vmem:[#allocation2 + $0x128] sm:$0x11]  ;;  %v301_v51 = vand.u32 %v1308_v7, %v231_v42  ;;  %v298_v52 = vand.u32 %v1308_v7, %v230_v43  ;;  %v68_v59 = vld [vmem:[#allocation2 + $0x120] sm:$0x11]  ;;  %v1319_v60 = vld [vmem:[%s1588_s0] sm:$0xf] }
   0xf   :  { %v187_v57 = vunpack.c.h.b16 %v69_v50  ;;  %v186_v58 = vunpack.c.l.b16 %v69_v50  ;;  %v295_v61 = vand.u32 %v1308_v7, %v229_v48  ;;  %v1153_v63 = vld [vmem:[#allocation2 + $0x90] sm:$0xf]  ;;  %v1233_v1 = vld [vmem:[#allocation2 + $0x94] sm:$0xf]  ;;  %v1166_v2 = vor.u32 %v1234_v53, %v1163_v54  ;;  %v1218_v5 = vld [vmem:[#allocation2 + $0x1c] sm:$0xf] }
  0x10   :  { %333 = vmatpush.bf16.msra.mxu0 %v1138_v26  ;;  %346 = vmatpush.bf16.msra.mxu1 %v1142_v27  ;;  %v292_v62 = vand.u32 %v1308_v7, %v228_v49  ;;  %v1241_v0 = vld [vmem:[#allocation2 + $0xcc] sm:$0xf0]  ;;  %v1162_v3 = vor.u32 %v1242_v56, %v1161_v55  ;;  %v1155_v4 = vld [vmem:[#allocation2 + $0xd0] sm:$0xf0]  ;;  %v1099_v6 = vld [vmem:[#allocation2 + $0x58] sm:$0xf0]  ;;  %v185_v8 = vunpack.c.h.b16 %v68_v59  ;;  %v184_v9 = vunpack.c.l.b16 %v68_v59 }
  0x11   :  { %359 = vmatpush.bf16.msra.mxu2 %v1146_v33  ;;  %372 = vmatpush.bf16.msra.mxu3 %v1150_v34  ;;  %v1097_v10 = vld [vmem:[#allocation2 + $0x18] sm:$0xf]  ;;  %v235_v12 = vpack.c.b16 %v187_v57, %v187_v57  ;;  %v234_v13 = vpack.c.b16 %v186_v58, %v186_v58  ;;  %v1154_v14 = vor.u32 %v1241_v0, %v1153_v63  ;;  %v1089_v17 = vld [vmem:[#allocation2 + $0x10] sm:$0xf]  ;;  %v1217_v19 = vld [vmem:[#allocation2 + $0x14] sm:$0xf] }
  0x12   :  { %v1226_v11 = vld [vmem:[#allocation2 + $0x54] sm:$0xf0]  ;;  %v1158_v15 = vor.u32 %v1233_v1, %v1155_v4  ;;  %v1102_v16 = vor.u32 %v1218_v5, %v1099_v6  ;;  %v1225_v18 = vld [vmem:[#allocation2 + $0x4c] sm:$0xf0]  ;;  %v1091_v20 = vld [vmem:[#allocation2 + $0x50] sm:$0xf0]  ;;  %v233_v22 = vpack.c.b16 %v185_v8, %v185_v8  ;;  %v232_v23 = vpack.c.b16 %v184_v9, %v184_v9 }
  0x13   :  { %v1098_v21 = vor.u32 %v1226_v11, %v1097_v10  ;;  %v313_v24 = vand.u32 %v1308_v7, %v235_v12  ;;  %v310_v25 = vand.u32 %v1308_v7, %v234_v13  ;;  %v1236_v26 = vld [vmem:[#allocation2 + $0xac] sm:$0xf]  ;;  %v1177_v28 = vld [vmem:[#allocation2 + $0xa8] sm:$0xf]  ;;  %v71_v30 = vld [vmem:[#allocation2 + $0x138] sm:$0x11]  ;;  %v1090_v31 = vor.u32 %v1225_v18, %v1089_v17 }
  0x14   :  { %334 = vmatpush.bf16.msra.mxu0 %v1074_v44  ;;  %347 = vmatpush.bf16.msra.mxu1 %v1078_v45  ;;  %v1179_v27 = vld [vmem:[#allocation2 + $0xe8] sm:$0xf0]  ;;  %v1244_v29 = vld [vmem:[#allocation2 + $0xe4] sm:$0xf0]  ;;  %v1094_v32 = vor.u32 %v1217_v19, %v1091_v20  ;;  %v70_v33 = vld [vmem:[#allocation2 + $0x130] sm:$0x11]  ;;  %v307_v34 = vand.u32 %v1308_v7, %v233_v22  ;;  %v304_v35 = vand.u32 %v1308_v7, %v232_v23  ;;  %v191_v42 = vunpack.c.h.b16 %v71_v30 }
  0x15   :  { %360 = vmatpush.bf16.msra.mxu2 %v1082_v46  ;;  %373 = vmatpush.bf16.msra.mxu3 %v1086_v47  ;;  %v1169_v36 = vld [vmem:[#allocation2 + $0xa0] sm:$0xf]  ;;  %v1182_v37 = vor.u32 %v1236_v26, %v1179_v27  ;;  %v1178_v38 = vor.u32 %v1244_v29, %v1177_v28  ;;  %v1235_v40 = vld [vmem:[#allocation2 + $0xa4] sm:$0xf]  ;;  %v190_v43 = vunpack.c.l.b16 %v71_v30  ;;  %v189_v44 = vunpack.c.h.b16 %v70_v33  ;;  %v1220_v46 = vld [vmem:[#allocation2 + $0x2c] sm:$0xf] }
  0x16   :  { %v1243_v39 = vld [vmem:[#allocation2 + $0xdc] sm:$0xf0]  ;;  %v1171_v41 = vld [vmem:[#allocation2 + $0xe0] sm:$0xf0]  ;;  %v188_v45 = vunpack.c.l.b16 %v70_v33  ;;  %v1115_v47 = vld [vmem:[#allocation2 + $0x68] sm:$0xf0]  ;;  %v239_v56 = vpack.c.b16 %v191_v42, %v191_v42 }
  0x17   :  { %1199 = vmatmul.msk.bf16.vlgmr.msra.gmra.mxu0 %vm272_vm1, %v1319_v60  ;;  %1200 = vmatmul.msk.bf16.vlgmr.msra.gmra.mxu1 %vm272_vm1, %v1319_v60  ;;  %v1170_v48 = vor.u32 %v1243_v39, %v1169_v36  ;;  %v1174_v49 = vor.u32 %v1235_v40, %v1171_v41  ;;  %v1105_v50 = vld [vmem:[#allocation2 + $0x20] sm:$0xf]  ;;  %v1219_v54 = vld [vmem:[#allocation2 + $0x24] sm:$0xf]  ;;  %v238_v57 = vpack.c.b16 %v190_v43, %v190_v43  ;;  %v1195_v4 = vld [vmem:[#allocation2 + $0xf8] sm:$0xf0] }
  0x18   :  { %1201 = vmatmul.msk.bf16.vlgmr.msra.gmra.mxu2 %vm272_vm1, %v1319_v60  ;;  %1202 = vmatmul.msk.bf16.vlgmr.msra.gmra.mxu3 %vm272_vm1, %v1319_v60  ;;  %v1227_v53 = vld [vmem:[#allocation2 + $0x5c] sm:$0xf0]  ;;  %v1107_v55 = vld [vmem:[#allocation2 + $0x60] sm:$0xf0]  ;;  %v237_v58 = vpack.c.b16 %v189_v44, %v189_v44  ;;  %v236_v59 = vpack.c.b16 %v188_v45, %v188_v45  ;;  %v325_v1 = vand.u32 %v1308_v7, %v239_v56  ;;  %v1193_v8 = vld [vmem:[#allocation2 + $0xb8] sm:$0xf] }
  0x19   :  { %423 = vmatpush.bf16.msrb.mxu3 %v301_v51  ;;  %410 = vmatpush.bf16.msrb.mxu2 %v298_v52  ;;  %v1113_v51 = vld [vmem:[#allocation2 + $0x28] sm:$0xf]  ;;  %v1106_v63 = vor.u32 %v1227_v53, %v1105_v50  ;;  %v1110_v0 = vor.u32 %v1219_v54, %v1107_v55  ;;  %v1246_v9 = vld [vmem:[#allocation2 + $0xf4] sm:$0xf0]  ;;  %v1185_v10 = vld [vmem:[#allocation2 + $0xb0] sm:$0xf] }
  0x1a   :  { %397 = vmatpush.bf16.msrb.mxu1 %v295_v61  ;;  %384 = vmatpush.bf16.msrb.mxu0 %v292_v62  ;;  %v1228_v52 = vld [vmem:[#allocation2 + $0x64] sm:$0xf0]  ;;  %v1118_v61 = vor.u32 %v1220_v46, %v1115_v47  ;;  %v319_v5 = vand.u32 %v1308_v7, %v237_v58  ;;  %v316_v6 = vand.u32 %v1308_v7, %v236_v59  ;;  %v1245_v11 = vld [vmem:[#allocation2 + $0xec] sm:$0xf0]  ;;  %v1237_v12 = vld [vmem:[#allocation2 + $0xb4] sm:$0xf] }
  0x1b   :  { %v1114_v62 = vor.u32 %v1228_v52, %v1113_v51  ;;  %v1187_v13 = vld [vmem:[#allocation2 + $0xf0] sm:$0xf0]  ;;  %v1131_v17 = vld [vmem:[#allocation2 + $0x78] sm:$0xf0]  ;;  %v1186_v18 = vor.u32 %v1245_v11, %v1185_v10  ;;  %v1121_v19 = vld [vmem:[#allocation2 + $0x30] sm:$0xf] }
  0x1c   :  { %v1129_v20 = vld [vmem:[#allocation2 + $0x38] sm:$0xf]  ;;  %v1229_v22 = vld [vmem:[#allocation2 + $0x6c] sm:$0xf0]  ;;  %v1221_v23 = vld [vmem:[#allocation2 + $0x34] sm:$0xf] }
  0x1d   :  { %424 = vmatpush.bf16.msrb.mxu3 %v1166_v2  ;;  %411 = vmatpush.bf16.msrb.mxu2 %v1162_v3  ;;  %v322_v2 = vand.u32 %v1308_v7, %v238_v57  ;;  %v1238_v3 = vld [vmem:[#allocation2 + $0xbc] sm:$0xf]  ;;  %v1190_v7 = vor.u32 %v1237_v12, %v1187_v13  ;;  %v1122_v27 = vor.u32 %v1229_v22, %v1121_v19  ;;  %vm575_vm2 = vcmask 1043456  }
  0x1e   :  { %385 = vmatpush.bf16.msrb.mxu0 %v1154_v14  ;;  %398 = vmatpush.bf16.msrb.mxu1 %v1158_v15  ;;  %v1198_v14 = vor.u32 %v1238_v3, %v1195_v4  ;;  %v1194_v15 = vor.u32 %v1246_v9, %v1193_v8  ;;  %v1283_v3 = vmov 1983009808   ;;  %vm617_vm3 = vcmask 1047556  }
  0x1f   :  { %v622_v4 = vunpack.c.l.s4 %v1283_v3  ;;  %vm1049_vm4 = vcmask 1041409   ;;  %vm1051_vm5 = vcmask 1042434   ;;  %vm1053_vm6 = vcmask 1043459  }
  0x20   :  { %vm1055_vm7 = vcmask 1044484   ;;  %vm1057_vm8 = vcmask 1045509   ;;  %vm1059_vm9 = vcmask 1046534   ;;  %vm1061_vm10 = vcmask 1047559  }
  0x21   :  { %425 = vmatpush.bf16.msrb.mxu3 %v1102_v16  ;;  %412 = vmatpush.bf16.msrb.mxu2 %v1098_v21  ;;  %v1222_v16 = vld [vmem:[#allocation2 + $0x3c] sm:$0xf]  ;;  %v1230_v21 = vld [vmem:[#allocation2 + $0x74] sm:$0xf0]  ;;  %vm1064_vm11 = vcmask 31744  }
  0x22   :  { %386 = vmatpush.bf16.msrb.mxu0 %v1090_v31  ;;  %399 = vmatpush.bf16.msrb.mxu1 %v1094_v32  ;;  %v1130_v26 = vor.u32 %v1230_v21, %v1129_v20  ;;  %v1386_v20 = vunpack.c.0.s8 %v622_v4 }
  0x25   :  { %475 = vmatpush.bf16.msra.mxu3 %v313_v24  ;;  %462 = vmatpush.bf16.msra.mxu2 %v310_v25  ;;  %v1123_v24 = vld [vmem:[#allocation2 + $0x70] sm:$0xf0]  ;;  %v1134_v25 = vor.u32 %v1222_v16, %v1131_v17 }
  0x26   :  { %449 = vmatpush.bf16.msra.mxu1 %v307_v34  ;;  %436 = vmatpush.bf16.msra.mxu0 %v304_v35  ;;  %v1126_v28 = vor.u32 %v1221_v23, %v1123_v24 }
  0x27   :  { %1203 = vmatmul.msk.bf16.vlgmr.msrb.gmra.mxu0 %vm272_vm1, %v1319_v60  ;;  %1204 = vmatmul.msk.bf16.vlgmr.msrb.gmra.mxu1 %vm272_vm1, %v1319_v60 }
  0x28   :  { %1205 = vmatmul.msk.bf16.vlgmr.msrb.gmra.mxu2 %vm272_vm1, %v1319_v60  ;;  %1206 = vmatmul.msk.bf16.vlgmr.msrb.gmra.mxu3 %vm272_vm1, %v1319_v60 }
  0x29   :  { %476 = vmatpush.bf16.msra.mxu3 %v1182_v37  ;;  %463 = vmatpush.bf16.msra.mxu2 %v1178_v38 }
  0x2a   :  { %437 = vmatpush.bf16.msra.mxu0 %v1170_v48  ;;  %450 = vmatpush.bf16.msra.mxu1 %v1174_v49 }
  0x2d   :  { %477 = vmatpush.bf16.msra.mxu3 %v1118_v61  ;;  %464 = vmatpush.bf16.msra.mxu2 %v1114_v62 }
  0x2e   :  { %438 = vmatpush.bf16.msra.mxu0 %v1106_v63  ;;  %451 = vmatpush.bf16.msra.mxu1 %v1110_v0 }
  0x31   :  { %527 = vmatpush.bf16.msrb.mxu3 %v325_v1  ;;  %514 = vmatpush.bf16.msrb.mxu2 %v322_v2 }
  0x32   :  { %501 = vmatpush.bf16.msrb.mxu1 %v319_v5  ;;  %488 = vmatpush.bf16.msrb.mxu0 %v316_v6 }
  0x35   :  { %528 = vmatpush.bf16.msrb.mxu3 %v1198_v14  ;;  %515 = vmatpush.bf16.msrb.mxu2 %v1194_v15 }
  0x36   :  { %489 = vmatpush.bf16.msrb.mxu0 %v1186_v18  ;;  %502 = vmatpush.bf16.msrb.mxu1 %v1190_v7 }
  0x37   :  { %1207 = vmatmul.msk.bf16.vlgmr.msra.gmra.mxu0 %vm272_vm1, %v1319_v60  ;;  %1208 = vmatmul.msk.bf16.vlgmr.msra.gmra.mxu1 %vm272_vm1, %v1319_v60 }
  0x38   :  { %1209 = vmatmul.msk.bf16.vlgmr.msra.gmra.mxu2 %vm272_vm1, %v1319_v60  ;;  %1210 = vmatmul.msk.bf16.vlgmr.msra.gmra.mxu3 %vm272_vm1, %v1319_v60 }
  0x39   :  { %529 = vmatpush.bf16.msrb.mxu3 %v1134_v25  ;;  %516 = vmatpush.bf16.msrb.mxu2 %v1130_v26 }
  0x3a   :  { %490 = vmatpush.bf16.msrb.mxu0 %v1122_v27  ;;  %503 = vmatpush.bf16.msrb.mxu1 %v1126_v28 }
  0x47   :  { %1211 = vmatmul.msk.bf16.vlgmr.msrb.gmra.mxu0 %vm272_vm1, %v1319_v60  ;;  %1212 = vmatmul.msk.bf16.vlgmr.msrb.gmra.mxu1 %vm272_vm1, %v1319_v60 }
  0x48   :  { %1213 = vmatmul.msk.bf16.vlgmr.msrb.gmra.mxu2 %vm272_vm1, %v1319_v60  ;;  %1214 = vmatmul.msk.bf16.vlgmr.msrb.gmra.mxu3 %vm272_vm1, %v1319_v60 }
  0x94   :  { %v336_v29 = vpop.f32.mrf.mxu0  ;;  %v349_v30 = vpop.f32.mrf.mxu1 }
  0x95   :  { %v536_v60 = vmax.f32 %v349_v30, 0.0  ;;  %v535_v50 = vmax.f32 %v336_v29, 0.0 }
  0x97   :  { %v567_v51 = vrot.slane %v536_v60, 4 }
  0x99   :  { %v576_v58 = vsel %vm575_vm2, %v535_v50, %v567_v51  ;;  %v1371_v59 = vsel %vm575_vm2, %v567_v51, %v535_v50 }
  0x9a   :  { %v579_v8 = vrot.slane %v1371_v59, 4  ;;  %v619_v9 = vrot.slane %v576_v58, 4 }
  0x9b   :  { %v362_v31 = vpop.f32.mrf.mxu2  ;;  %v375_v32 = vpop.f32.mrf.mxu3 }
  0x9c   :  { %v338_v33 = vpop.f32.mrf.mxu0  ;;  %v351_v34 = vpop.f32.mrf.mxu1  ;;  %v538_v54 = vmax.f32 %v375_v32, 0.0  ;;  %v537_v61 = vmax.f32 %v362_v31, 0.0  ;;  %v675_v21 = vrot.slane %v579_v8, 4  ;;  %v1284_v32 = vmov 1934713408  }
  0x9d   :  { %v646_v33 = vunpack.c.l.s4 %v1284_v32 }
  0x9e   :  { %v568_v62 = vrot.slane %v538_v54, 4 }
  0xa0   :  { %v1376_v12 = vsel %vm575_vm2, %v537_v61, %v568_v62  ;;  %v1379_v13 = vsel %vm575_vm2, %v568_v62, %v537_v61 }
  0xa1   :  { %v581_v22 = vrot.slane %v1379_v13, 4  ;;  %v731_v23 = vrot.slane %v1376_v12, 4 }
  0xa3   :  { %v364_v35 = vpop.f32.mrf.mxu2  ;;  %v377_v36 = vpop.f32.mrf.mxu3  ;;  %v1414_v50 = vrot.slane %v581_v22, 4 }
  0xa4   :  { %v388_v37 = vpop.f32.mrf.mxu0  ;;  %v401_v38 = vpop.f32.mrf.mxu1 }
  0xa5   :  { %v540_v55 = vmax.f32 %v401_v38, 0.0  ;;  %v539_v63 = vmax.f32 %v388_v37, 0.0 }
  0xa7   :  { %v569_v0 = vrot.slane %v540_v55, 4 }
  0xa9   :  { %v582_v14 = vsel %vm575_vm2, %v539_v63, %v569_v0  ;;  %v1383_v15 = vsel %vm575_vm2, %v569_v0, %v539_v63 }
  0xaa   :  { %v585_v25 = vrot.slane %v1383_v15, 4  ;;  %v631_v26 = vrot.slane %v582_v14, 4 }
  0xab   :  { %v1363_v39 = vpop.f32.mrf.mxu2  ;;  %v427_v40 = vpop.f32.mrf.mxu3 }
  0xac   :  { %v390_v41 = vpop.f32.mrf.mxu0  ;;  %v403_v42 = vpop.f32.mrf.mxu1  ;;  %v542_v1 = vmax.f32 %v427_v40, 0.0  ;;  %v541_v7 = vmax.f32 %v1363_v39, 0.0  ;;  %v687_v54 = vrot.slane %v585_v25, 4 }
  0xae   :  { %v570_v19 = vrot.slane %v542_v1, 4 }
  0xb0   :  { %v1399_v34 = vsel %vm575_vm2, %v541_v7, %v570_v19  ;;  %v1406_v40 = vsel %vm575_vm2, %v570_v19, %v541_v7 }
  0xb1   :  { %v587_v55 = vrot.slane %v1406_v40, 4 }
  0xb3   :  { %v416_v43 = vpop.f32.mrf.mxu2  ;;  %v429_v44 = vpop.f32.mrf.mxu3 }
  0xb4   :  { %v440_v45 = vpop.f32.mrf.mxu0  ;;  %v453_v46 = vpop.f32.mrf.mxu1 }
  0xb5   :  { %v544_v47 = vmax.f32 %v453_v46, 0.0  ;;  %v543_v56 = vmax.f32 %v440_v45, 0.0 }
  0xb7   :  { %v571_v57 = vrot.slane %v544_v47, 4 }
  0xb9   :  { %v588_v2 = vsel %vm575_vm2, %v543_v56, %v571_v57  ;;  %v590_v27 = vsel %vm575_vm2, %v571_v57, %v543_v56  ;;  %v1419_v56 = vunpack.c.0.s8 %v646_v33 }
  0xba   :  { %v616_v16 = vrot.slane %v588_v2, 4  ;;  %v620_v35 = vsel %vm617_vm3, %v588_v2, %v619_v9  ;;  %v591_v41 = vrot.slane %v590_v27, 4  ;;  %v1431_v9 = vld [vmem:[%s1590_s2] sm:$0xff] }
  0xbb   :  { %v1365_v48 = vpop.f32.mrf.mxu2  ;;  %v1367_v49 = vpop.f32.mrf.mxu3  ;;  %v628_v51 = vperm.slane %v620_v35, %v1386_v20 }
  0xbc   :  { %v442_v52 = vpop.f32.mrf.mxu0  ;;  %v455_v53 = vpop.f32.mrf.mxu1  ;;  %v546_v28 = vmax.f32 %v1367_v49, 0.0  ;;  %v618_v29 = vsel %vm617_vm3, %v616_v16, %v576_v58  ;;  %v545_v60 = vmax.f32 %v1365_v48, 0.0  ;;  %v743_v48 = vrot.slane %v1399_v34, 4 }
  0xbd   :  { %v624_v46 = vperm.slane %v618_v29, %v1386_v20  ;;  %v673_v0 = vrot.slane %v591_v41, 4  ;;  %v655_v3 = vrot.slane %v628_v51, 4  ;;  %v676_v4 = vsel %vm617_vm3, %v591_v41, %v675_v21 }
  0xbe   :  { %v572_v47 = vrot.slane %v546_v28, 4  ;;  %v1442_v28 = vunpack.c.l.bf16 %v1431_v9 }
  0xbf   :  { %v643_v63 = vrot.slane %v624_v46, 4  ;;  %v674_v29 = vsel %vm617_vm3, %v673_v0, %v579_v8 }
  0xc0   :  { %v589_v1 = vsel %vm575_vm2, %v545_v60, %v572_v47 }
  0xc1   :  { %v729_v7 = vrot.slane %v589_v1, 4 }
  0xc3   :  { %v468_v5 = vpop.f32.mrf.mxu2  ;;  %v481_v6 = vpop.f32.mrf.mxu3  ;;  %v730_v59 = vsel %vm617_vm3, %v729_v7, %v1376_v12 }
  0xc4   :  { %v492_v10 = vpop.f32.mrf.mxu0  ;;  %v505_v11 = vpop.f32.mrf.mxu1  ;;  %v736_v12 = vperm.slane %v730_v59, %v1386_v20 }
  0xc5   :  { %v547_v17 = vmax.f32 %v492_v10, 0.0  ;;  %v548_v18 = vmax.f32 %v505_v11, 0.0 }
  0xc7   :  { %v573_v24 = vrot.slane %v548_v18, 4  ;;  %v799_v18 = vrot.slane %v587_v55, 4 }
  0xc9   :  { %v594_v30 = vsel %vm575_vm2, %v547_v17, %v573_v24  ;;  %v596_v31 = vsel %vm575_vm2, %v573_v24, %v547_v17 }
  0xca   :  { %v629_v36 = vrot.slane %v594_v30, 4  ;;  %v632_v37 = vsel %vm617_vm3, %v594_v30, %v631_v26  ;;  %v597_v42 = vrot.slane %v596_v31, 4  ;;  %v684_v30 = vperm.slane %v676_v4, %v1386_v20 }
  0xcb   :  { %v1403_v38 = vpop.f32.mrf.mxu2  ;;  %v531_v39 = vpop.f32.mrf.mxu3  ;;  %v640_v43 = vperm.slane %v632_v37, %v1386_v20  ;;  %v592_v31 = vsel %vm575_vm2, %v572_v47, %v545_v60 }
  0xcc   :  { %v494_v44 = vpop.f32.mrf.mxu0  ;;  %v507_v45 = vpop.f32.mrf.mxu1  ;;  %v630_v49 = vsel %vm617_vm3, %v629_v36, %v582_v14  ;;  %v550_v57 = vmax.f32 %v531_v39, 0.0  ;;  %v685_v62 = vrot.slane %v597_v42, 4  ;;  %v688_v6 = vsel %vm617_vm3, %v597_v42, %v687_v54 }
  0xcd   :  { %v636_v52 = vperm.slane %v630_v49, %v1386_v20  ;;  %v653_v53 = vrot.slane %v640_v43, 4  ;;  %v549_v14 = vmax.f32 %v1403_v38, 0.0  ;;  %v656_v24 = vsel %vm617_vm3, %v640_v43, %v655_v3 }
  0xce   :  { %v574_v15 = vrot.slane %v550_v57, 4  ;;  %v686_v21 = vsel %vm617_vm3, %v685_v62, %v585_v25  ;;  %v696_v27 = vperm.slane %v688_v6, %v1386_v20  ;;  %v732_v25 = vsel %vm617_vm3, %v589_v1, %v731_v23 }
  0xcf   :  { %v641_v58 = vrot.slane %v636_v52, 4  ;;  %v654_v61 = vsel %vm617_vm3, %v653_v53, %v628_v51  ;;  %v644_v10 = vsel %vm617_vm3, %v636_v52, %v643_v63  ;;  %v1455_v35 = vperm.slane %v686_v21, %v1386_v20 }
  0xd0   :  { %v660_v2 = vperm.slane %v654_v61, %v1419_v56  ;;  %v652_v32 = vperm.slane %v644_v10, %v1419_v56  ;;  %v595_v36 = vsel %vm575_vm2, %v549_v14, %v574_v15  ;;  %v664_v8 = vperm.slane %v656_v24, %v1419_v56 }
  0xd1   :  { %v642_v5 = vsel %vm617_vm3, %v641_v58, %v624_v46  ;;  %v1464_v39 = vperm.slane %v674_v29, %v1386_v20  ;;  %v593_v23 = vrot.slane %v592_v31, 4  ;;  %v709_v41 = vrot.slane %v696_v27, 4 }
  0xd2   :  { %v648_v11 = vperm.slane %v642_v5, %v1419_v56  ;;  %v665_v19 = vrot.slane %v660_v2, 4  ;;  %v598_v42 = vsel %vm575_vm2, %v574_v15, %v549_v14  ;;  %v740_v43 = vperm.slane %v732_v25, %v1386_v20 }
  0xd3   :  { %v520_v16 = vpop.f32.mrf.mxu2  ;;  %v533_v17 = vpop.f32.mrf.mxu3  ;;  %v671_v44 = vrot.slane %v652_v32, 4  ;;  %v599_v45 = vrot.slane %v598_v42, 4  ;;  %v741_v46 = vrot.slane %v595_v36, 4  ;;  %v697_v60 = vrot.slane %v1455_v35, 4 }
  0xd4   :  { %v667_v26 = vrot.slane %v648_v11, 4  ;;  %v666_v37 = vsel %vm617_vm3, %v665_v19, %v648_v11  ;;  %v744_v47 = vsel %vm617_vm3, %v595_v36, %v743_v48  ;;  %v669_v51 = vrot.slane %v664_v8, 4 }
  0xd5   :  { %v844_v49 = vmul.f32 %v1442_v28, %v666_v37  ;;  %v742_v52 = vsel %vm617_vm3, %v741_v46, %v1399_v34  ;;  %v752_v53 = vperm.slane %v744_v47, %v1386_v20  ;;  %v797_v54 = vrot.slane %v599_v45, 4 }
  0xd6   :  { %v668_v33 = vsel %vm617_vm3, %v660_v2, %v667_v26  ;;  %v711_v57 = vrot.slane %v684_v30, 4  ;;  %v710_v58 = vsel %vm617_vm3, %v709_v41, %v684_v30  ;;  %v748_v61 = vperm.slane %v742_v52, %v1386_v20 }
  0xd7   :  { %v846_v38 = vmul.f32 %v1442_v28, %v668_v33  ;;  %v800_v62 = vsel %vm617_vm3, %v599_v45, %v799_v18  ;;  %876 = vst [vmem:[#allocation1] ss:$2 sm:$0xff] %v844_v49  ;;  %v767_v63 = vrot.slane %v740_v43, 4  ;;  %v785_v0 = vrot.slane %v593_v23, 4 }
  0xd8   :  { %v672_v48 = vsel %vm617_vm3, %v664_v8, %v671_v44  ;;  %v765_v1 = vrot.slane %v752_v53, 4  ;;  %v755_v2 = vrot.slane %v736_v12, 4  ;;  %v698_v34 = vsel %vm617_vm3, %v697_v60, %v1464_v39 }
  0xd9   :  { %884 = vst [vmem:[#allocation1 + $0x20] ss:$2 sm:$0xff] %v846_v38  ;;  %v753_v3 = vrot.slane %v748_v61, 4  ;;  %v798_v4 = vsel %vm617_vm3, %v797_v54, %v587_v55  ;;  %v670_v5 = vsel %vm617_vm3, %v669_v51, %v652_v32  ;;  %v716_v6 = vperm.slane %v710_v58, %v1419_v56 }
  0xda   :  { %v766_v10 = vsel %vm617_vm3, %v765_v1, %v740_v43  ;;  %v808_v11 = vperm.slane %v800_v62, %v1386_v20  ;;  %v850_v14 = vmul.f32 %v1442_v28, %v672_v48  ;;  %v768_v16 = vsel %vm617_vm3, %v752_v53, %v767_v63 }
  0xdb   :  { %v754_v15 = vsel %vm617_vm3, %v753_v3, %v736_v12  ;;  %v772_v17 = vperm.slane %v766_v10, %v1419_v56  ;;  %v788_v40 = vsel %vm617_vm3, %v593_v23, %v1414_v50  ;;  %v704_v55 = vperm.slane %v698_v34, %v1419_v56 }
  0xdc   :  { %v760_v7 = vperm.slane %v754_v15, %v1419_v56  ;;  %v804_v19 = vperm.slane %v798_v4, %v1386_v20  ;;  %v699_v24 = vrot.slane %v1464_v39, 4  ;;  %v712_v26 = vsel %vm617_vm3, %v696_v27, %v711_v57 }
  0xdd   :  { %v756_v29 = vsel %vm617_vm3, %v748_v61, %v755_v2  ;;  %v777_v30 = vrot.slane %v772_v17, 4  ;;  %v848_v31 = vmul.f32 %v1442_v28, %v670_v5  ;;  %v776_v50 = vperm.slane %v768_v16, %v1419_v56 }
  0xde   :  { %v779_v32 = vrot.slane %v760_v7, 4  ;;  %v821_v25 = vrot.slane %v808_v11, 4  ;;  %v879_v33 = vld.sshfl [vmem:[#allocation1] sm:$0xff pattern:$0x75316420]  ;;  %v786_v36 = vsel %vm617_vm3, %v785_v0, %v581_v22  ;;  %v796_v59 = vperm.slane %v788_v40, %v1386_v20 }
  0xdf   :  { %v721_v8 = vrot.slane %v716_v6, 4  ;;  %v1511_v27 = vunpack.c.h.bf16 %v1431_v9  ;;  %v880_v37 = vld.sshfl [vmem:[#allocation1 + $0x8] sm:$0xff pattern:$0x75316420]  ;;  %v723_v38 = vrot.slane %v704_v55, 4  ;;  %v764_v39 = vperm.slane %v756_v29, %v1419_v56 }
  0xe0   :  { %v1492_v18 = vld.sshfl [vmem:[#allocation1 + $0x20] sm:$0xff pattern:$0x75316420]  ;;  %v1499_v21 = vld.sshfl [vmem:[#allocation1 + $0x28] sm:$0xff pattern:$0x75316420]  ;;  %v778_v41 = vsel %vm617_vm3, %v777_v30, %v760_v7  ;;  %v720_v42 = vperm.slane %v712_v26, %v1419_v56  ;;  %v780_v13 = vsel %vm617_vm3, %v772_v17, %v779_v32  ;;  %v792_v43 = vperm.slane %v786_v36, %v1386_v20 }
  0xe1   :  { %897 = vst [vmem:[#allocation1 + $0x20] ss:$2 sm:$0xff] %v850_v14  ;;  %v809_v23 = vrot.slane %v804_v19, 4  ;;  %v845_v22 = vmul.f32 %v1511_v27, %v778_v41  ;;  %v700_v9 = vsel %vm617_vm3, %v1455_v35, %v699_v24  ;;  %v781_v44 = vrot.slane %v776_v50, 4 }
  0xe2   :  { %891 = vst [vmem:[#allocation1] ss:$2 sm:$0xff] %v848_v31  ;;  %v822_v45 = vsel %vm617_vm3, %v821_v25, %v796_v59  ;;  %v823_v46 = vrot.slane %v796_v59, 4  ;;  %v722_v12 = vsel %vm617_vm3, %v721_v8, %v704_v55  ;;  %v724_v60 = vsel %vm617_vm3, %v716_v6, %v723_v38 }
  0xe3   :  { %878 = vst [vmem:[#allocation1 + $0x10] ss:$2 sm:$0xff] %v845_v22  ;;  %v783_v47 = vrot.slane %v764_v39, 4  ;;  %v810_v49 = vsel %vm617_vm3, %v809_v23, %v792_v43  ;;  %v847_v51 = vmul.f32 %v1511_v27, %v780_v13  ;;  %v708_v52 = vperm.slane %v700_v9, %v1419_v56 }
  0xe4   :  { %v725_v20 = vrot.slane %v720_v42, 4  ;;  %v828_v53 = vperm.slane %v822_v45, %v1419_v56  ;;  %v959_v35 = vsel %vm575_vm2, %v879_v33, 0.0  ;;  %v852_v57 = vmul.f32 %v1442_v28, %v722_v12 }
  0xe5   :  { %v782_v58 = vsel %vm617_vm3, %v781_v44, %v764_v39  ;;  %v960_v61 = vsel %vm575_vm2, %v880_v37, 0.0  ;;  %886 = vst [vmem:[#allocation1 + $0x30] ss:$2 sm:$0xff] %v847_v51  ;;  %v854_v63 = vmul.f32 %v1442_v28, %v724_v60  ;;  %v816_v0 = vperm.slane %v810_v49, %v1419_v56 }
  0xe6   :  { %v811_v2 = vrot.slane %v792_v43, 4  ;;  %v784_v34 = vsel %vm617_vm3, %v776_v50, %v783_v47  ;;  %v824_v3 = vsel %vm617_vm3, %v808_v11, %v823_v46  ;;  %v727_v4 = vrot.slane %v708_v52, 4 }
  0xe7   :  { %v833_v5 = vrot.slane %v828_v53, 4  ;;  %v849_v6 = vmul.f32 %v1511_v27, %v782_v58  ;;  %v726_v10 = vsel %vm617_vm3, %v725_v20, %v708_v52  ;;  %v961_v17 = vadd.f32 %v960_v61, %v959_v35 }
  0xe8   :  { %v899_v54 = vld.sshfl [vmem:[#allocation1 + $0x20] sm:$0xff pattern:$0x75316420]  ;;  %v900_v62 = vld.sshfl [vmem:[#allocation1 + $0x28] sm:$0xff pattern:$0x75316420]  ;;  %v812_v14 = vsel %vm617_vm3, %v804_v19, %v811_v2  ;;  %v832_v40 = vperm.slane %v824_v3, %v1419_v56  ;;  %v851_v7 = vmul.f32 %v1511_v27, %v784_v34  ;;  %v856_v30 = vmul.f32 %v1442_v28, %v726_v10 }
  0xe9   :  { %v893_v48 = vld.sshfl [vmem:[#allocation1] sm:$0xff pattern:$0x75316420]  ;;  %v894_v1 = vld.sshfl [vmem:[#allocation1 + $0x8] sm:$0xff pattern:$0x75316420]  ;;  %v834_v31 = vsel %vm617_vm3, %v833_v5, %v816_v0  ;;  %v728_v8 = vsel %vm617_vm3, %v720_v42, %v727_v4 }
  0xea   :  { %903 = vst [vmem:[#allocation1] ss:$2 sm:$0xff] %v852_v57  ;;  %v881_v15 = vld.sshfl [vmem:[#allocation1 + $0x10] sm:$0xff pattern:$0x75316420]  ;;  %v835_v55 = vrot.slane %v816_v0, 4  ;;  %v853_v41 = vmul.f32 %v1511_v27, %v834_v31  ;;  %v858_v43 = vmul.f32 %v1442_v28, %v728_v8 }
  0xeb   :  { %909 = vst [vmem:[#allocation1 + $0x20] ss:$2 sm:$0xff] %v854_v63  ;;  %v882_v16 = vld.sshfl [vmem:[#allocation1 + $0x18] sm:$0xff pattern:$0x75316420]  ;;  %v962_v11 = vsel %vm575_vm2, %v881_v15, 0.0 }
  0xec   :  { %892 = vst [vmem:[#allocation1 + $0x10] ss:$2 sm:$0xff] %v849_v6  ;;  %v963_v24 = vadd.f32 %v962_v11, %v961_v17  ;;  %v964_v26 = vsel %vm575_vm2, %v882_v16, 0.0  ;;  %v968_v29 = vsel %vm575_vm2, %v1492_v18, 0.0  ;;  %v969_v19 = vsel %vm575_vm2, %v1499_v21, 0.0 }
  0xed   :  { %v889_v50 = vld.sshfl [vmem:[#allocation1 + $0x30] sm:$0xff pattern:$0x75316420]  ;;  %v890_v32 = vld.sshfl [vmem:[#allocation1 + $0x38] sm:$0xff pattern:$0x75316420]  ;;  %v820_v18 = vperm.slane %v812_v14, %v1419_v56  ;;  %v836_v38 = vsel %vm617_vm3, %v828_v53, %v835_v55  ;;  %v970_v23 = vadd.f32 %v969_v19, %v968_v29 }
  0xee   :  { %v965_v25 = vadd.f32 %v964_v26, %v963_v24  ;;  %898 = vst [vmem:[#allocation1 + $0x30] ss:$2 sm:$0xff] %v851_v7  ;;  %v971_v33 = vsel %vm575_vm2, %v889_v50, 0.0  ;;  %v977_v36 = vsel %vm575_vm2, %v893_v48, 0.0  ;;  %v978_v59 = vsel %vm575_vm2, %v894_v1, 0.0 }
  0xef   :  { %v837_v39 = vrot.slane %v832_v40, 4  ;;  %v972_v9 = vadd.f32 %v971_v33, %v970_v23  ;;  %v979_v42 = vadd.f32 %v978_v59, %v977_v36  ;;  %v839_v46 = vrot.slane %v820_v18, 4 }
  0xf0   :  { %966 = vadd.xlane.f32.xlu0 %v965_v25  ;;  %v855_v56 = vmul.f32 %v1511_v27, %v836_v38  ;;  %v986_v60 = vsel %vm575_vm2, %v899_v54, 0.0  ;;  %v973_v47 = vsel %vm575_vm2, %v890_v32, 0.0  ;;  %v987_v52 = vsel %vm575_vm2, %v900_v62, 0.0 }
  0xf1   :  { %v905_v37 = vld.sshfl [vmem:[#allocation1] sm:$0xff pattern:$0x75316420]  ;;  %v906_v21 = vld.sshfl [vmem:[#allocation1 + $0x8] sm:$0xff pattern:$0x75316420]  ;;  %v838_v53 = vsel %vm617_vm3, %v837_v39, %v820_v18  ;;  %v974_v35 = vadd.f32 %v973_v47, %v972_v9  ;;  %v840_v63 = vsel %vm617_vm3, %v832_v40, %v839_v46  ;;  %v988_v0 = vadd.f32 %v987_v52, %v986_v60 }
  0xf2   :  { %915 = vst [vmem:[#allocation1] ss:$2 sm:$0xff] %v856_v30  ;;  %v911_v13 = vld.sshfl [vmem:[#allocation1 + $0x20] sm:$0xff pattern:$0x75316420]  ;;  %v995_v61 = vsel %vm575_vm2, %v905_v37, 0.0  ;;  %v857_v62 = vmul.f32 %v1511_v27, %v838_v53  ;;  %v859_v5 = vmul.f32 %v1511_v27, %v840_v63 }
  0xf3   :  { %v912_v22 = vld.sshfl [vmem:[#allocation1 + $0x28] sm:$0xff pattern:$0x75316420]  ;;  %v895_v44 = vld.sshfl [vmem:[#allocation1 + $0x10] sm:$0xff pattern:$0x75316420] }
  0xf4   :  { %v896_v45 = vld.sshfl [vmem:[#allocation1 + $0x18] sm:$0xff pattern:$0x75316420]  ;;  %v980_v12 = vsel %vm575_vm2, %v895_v44, 0.0  ;;  %921 = vst [vmem:[#allocation1 + $0x20] ss:$2 sm:$0xff] %v858_v43 }
  0xf5   :  { %904 = vst [vmem:[#allocation1 + $0x10] ss:$2 sm:$0xff] %v853_v41  ;;  %v981_v49 = vadd.f32 %v980_v12, %v979_v42  ;;  %v982_v51 = vsel %vm575_vm2, %v896_v45, 0.0  ;;  %v901_v28 = vld.sshfl [vmem:[#allocation1 + $0x30] sm:$0xff pattern:$0x75316420]  ;;  %v1039_v42 = vlaneseq }
  0xf6   :  { %v902_v20 = vld.sshfl [vmem:[#allocation1 + $0x38] sm:$0xff pattern:$0x75316420]  ;;  %v989_v58 = vsel %vm575_vm2, %v901_v28, 0.0  ;;  %v996_v54 = vsel %vm575_vm2, %v906_v21, 0.0  ;;  %v1004_v48 = vsel %vm575_vm2, %v911_v13, 0.0 }
  0xf7   :  { %v983_v57 = vadd.f32 %v982_v51, %v981_v49  ;;  %910 = vst [vmem:[#allocation1 + $0x30] ss:$2 sm:$0xff] %v855_v56  ;;  %v990_v1 = vadd.f32 %v989_v58, %v988_v0  ;;  %v997_v3 = vadd.f32 %v996_v54, %v995_v61  ;;  %v991_v14 = vsel %vm575_vm2, %v902_v20, 0.0 }
  0xf8   :  { %975 = vadd.xlane.f32.xlu0 %v974_v35  ;;  %v1005_v17 = vsel %vm575_vm2, %v912_v22, 0.0  ;;  %v1040_v56 = vand.u32 127, %v1039_v42 }
  0xf9   :  { %984 = vadd.xlane.f32.xlu1 %v983_v57  ;;  %v917_v4 = vld.sshfl [vmem:[#allocation1] sm:$0xff pattern:$0x75316420]  ;;  %v918_v10 = vld.sshfl [vmem:[#allocation1 + $0x8] sm:$0xff pattern:$0x75316420]  ;;  %v992_v11 = vadd.f32 %v991_v14, %v990_v1  ;;  %v1006_v30 = vadd.f32 %v1005_v17, %v1004_v48 }
  0xfa   :  { %v1013_v29 = vsel %vm575_vm2, %v917_v4, 0.0  ;;  %v1014_v19 = vsel %vm575_vm2, %v918_v10, 0.0 }
  0xfb   :  { %v923_v40 = vld.sshfl [vmem:[#allocation1 + $0x20] sm:$0xff pattern:$0x75316420]  ;;  %v924_v26 = vld.sshfl [vmem:[#allocation1 + $0x28] sm:$0xff pattern:$0x75316420]  ;;  %v1015_v36 = vadd.f32 %v1014_v19, %v1013_v29 }
  0xfc   :  { %v907_v2 = vld.sshfl [vmem:[#allocation1 + $0x10] sm:$0xff pattern:$0x75316420]  ;;  %v908_v34 = vld.sshfl [vmem:[#allocation1 + $0x18] sm:$0xff pattern:$0x75316420] }
  0xfd   :  { %916 = vst [vmem:[#allocation1 + $0x10] ss:$2 sm:$0xff] %v857_v62  ;;  %v998_v6 = vsel %vm575_vm2, %v907_v2, 0.0  ;;  %v1000_v16 = vsel %vm575_vm2, %v908_v34, 0.0  ;;  %v1022_v31 = vsel %vm575_vm2, %v923_v40, 0.0  ;;  %v1023_v50 = vsel %vm575_vm2, %v924_v26, 0.0 }
  0xfe   :  { %v999_v15 = vadd.f32 %v998_v6, %v997_v3  ;;  %v913_v55 = vld.sshfl [vmem:[#allocation1 + $0x30] sm:$0xff pattern:$0x75316420]  ;;  %v914_v7 = vld.sshfl [vmem:[#allocation1 + $0x38] sm:$0xff pattern:$0x75316420]  ;;  %v1024_v39 = vadd.f32 %v1023_v50, %v1022_v31 }
  0xff   :  { %922 = vst [vmem:[#allocation1 + $0x30] ss:$2 sm:$0xff] %v859_v5  ;;  %v1007_v27 = vsel %vm575_vm2, %v913_v55, 0.0  ;;  %v1009_v8 = vsel %vm575_vm2, %v914_v7, 0.0 }
 0x100   :  { %v1001_v24 = vadd.f32 %v1000_v16, %v999_v15  ;;  %v1008_v32 = vadd.f32 %v1007_v27, %v1006_v30 }
 0x101   :  { %993 = vadd.xlane.f32.xlu1 %v992_v11 }
 0x102   :  { %1002 = vadd.xlane.f32.xlu2 %v1001_v24  ;;  %v1010_v23 = vadd.f32 %v1009_v8, %v1008_v32 }
 0x104   :  { %v919_v25 = vld.sshfl [vmem:[#allocation1 + $0x10] sm:$0xff pattern:$0x75316420]  ;;  %v920_v33 = vld.sshfl [vmem:[#allocation1 + $0x18] sm:$0xff pattern:$0x75316420] }
 0x105   :  { %v1016_v59 = vsel %vm575_vm2, %v919_v25, 0.0  ;;  %v1018_v37 = vsel %vm575_vm2, %v920_v33, 0.0 }
 0x106   :  { %v1017_v18 = vadd.f32 %v1016_v59, %v1015_v36  ;;  %v925_v21 = vld.sshfl [vmem:[#allocation1 + $0x30] sm:$0xff pattern:$0x75316420]  ;;  %v926_v38 = vld.sshfl [vmem:[#allocation1 + $0x38] sm:$0xff pattern:$0x75316420] }
 0x107   :  { %v1025_v13 = vsel %vm575_vm2, %v925_v21, 0.0  ;;  %v1027_v43 = vsel %vm575_vm2, %v926_v38, 0.0 }
 0x108   :  { %v1019_v41 = vadd.f32 %v1018_v37, %v1017_v18  ;;  %v1026_v22 = vadd.f32 %v1025_v13, %v1024_v39 }
 0x10a   :  { %1011 = vadd.xlane.f32.xlu2 %v1010_v23  ;;  %1020 = vadd.xlane.f32.xlu0 %v1019_v41  ;;  %v1028_v9 = vadd.f32 %v1027_v43, %v1026_v22 }
 0x10c   :  { %1029 = vadd.xlane.f32.xlu1 %v1028_v9 }
 0x163   :  { %v967_v44 = vpop.xlane.xlu0 %966 }
 0x164   :  { %v1041_v49 = vperm.slane %v967_v44, %v1040_v56 }
 0x16b   :  { %v976_v46 = vpop.xlane.xlu0 %975 }
 0x16c   :  { %v985_v45 = vpop.xlane.xlu1 %984  ;;  %v1042_v12 = vperm.slane %v976_v46, %v1040_v56 }
 0x16d   :  { %v1043_v51 = vperm.slane %v985_v45, %v1040_v56 }
 0x16e   :  { %v1050_v52 = vsel %vm1049_vm4, %v1042_v12, %v1041_v49 }
 0x16f   :  { %v1052_v20 = vsel %vm1051_vm5, %v1043_v51, %v1050_v52 }
 0x174   :  { %v994_v60 = vpop.xlane.xlu1 %993 }
 0x175   :  { %v1003_v47 = vpop.xlane.xlu2 %1002  ;;  %v1044_v28 = vperm.slane %v994_v60, %v1040_v56 }
 0x176   :  { %v1045_v53 = vperm.slane %v1003_v47, %v1040_v56 }
 0x177   :  { %v1054_v35 = vsel %vm1053_vm6, %v1044_v28, %v1052_v20 }
 0x178   :  { %v1056_v63 = vsel %vm1055_vm7, %v1045_v53, %v1054_v35 }
 0x17d   :  { %v1012_v57 = vpop.xlane.xlu2 %1011  ;;  %v1021_v58 = vpop.xlane.xlu0 %1020 }
 0x17e   :  { %v1046_v61 = vperm.slane %v1012_v57, %v1040_v56  ;;  %v1047_v54 = vperm.slane %v1021_v58, %v1040_v56 }
 0x17f   :  { %v1030_v62 = vpop.xlane.xlu1 %1029 }
 0x180   :  { %v1058_v0 = vsel %vm1057_vm8, %v1046_v61, %v1056_v63  ;;  %v1048_v1 = vperm.slane %v1030_v62, %v1040_v56 }
 0x181   :  { %v1060_v48 = vsel %vm1059_vm9, %v1047_v54, %v1058_v0 }
 0x182   :  { %v1062_v2 = vsel %vm1061_vm10, %v1048_v1, %v1060_v48 }
 0x183   :  { %1065 = vst.msk [vmem:[%s1591_s3] sm:$0xff] %vm1064_vm11, %v1062_v2 }
 0x184   :  { %1070 = vsyncpa [#allocation3], 1 }

</bundles_post_ra>
